<compile_context>
chip_gen: v7x
topology: tpu7x:2x2x1
jax: 0.10.0
libtpu: 0.0.40
codegen_flags: <defaults>
</compile_context>

<pallas_src>
import jax
import jax.numpy as jnp
from jax.experimental import pallas as pl
from jax.experimental.pallas import tpu as pltpu


def _round_up(x, m):
    return ((x + m - 1) // m) * m


def _choose_tile_n(n, tile_n):
    """Pick the row-tile size.

    * Small bags (< 1024 rows): one exact tile (blocks == full array dims, no
      padding at all).
    * Otherwise tile_n is a multiple of 128 (lane-dense (C, tile_n) output
      block) and clamped so the grid has at least 2 steps, keeping both v7x
      TensorCores busy under dimension_semantics=("parallel",).
    """
    tile_n = max(128, (int(tile_n) // 128) * 128)
    if n < 1024:
        return n
    two_steps = _round_up(pl.cdiv(n, 2), 128)
    return min(tile_n, two_steps)


def _attn_net_kernel(x_ref, w1_ref, b1_ref, w2t_ref, b2_ref, out_ref):
    # First linear on the MXU: x is cast to bf16 per-tile (single-pass bf16
    # matmul), accumulation in f32; bias add + tanh stay in f32 (EUP/VPU).
    x_bf = x_ref[...].astype(jnp.bfloat16)
    h = jnp.dot(x_bf, w1_ref[...], preferred_element_type=jnp.float32)
    h = jnp.tanh(h + b1_ref[...])
    # Second linear produced directly in transposed (C, tile_n) form so the
    # output block is lane-dense: (C, D) . (tile_n, D)^T -> (C, tile_n).
    a = jnp.einsum("cd,nd->cn", w2t_ref[...], h,
                   preferred_element_type=jnp.float32)
    # NOTE: output column j depends only on input row j, so garbage rows in a
    # ragged last x tile only touch output columns Pallas masks on writeback.
    # Do not add cross-row ops (e.g. softmax over N) here without masking.
    out_ref[...] = (a + b2_ref[...]).astype(out_ref.dtype)


def attn_net_forward(x, w1, b1, w2, b2, *, tile_n=2048, dropout=False):
    """Returns (A, x) matching Attn_Net.forward semantics.

    x : (N, L) float32 (bf16 also accepted -- cast happens per-tile in-kernel)
    w1: (L, D), b1: (1, D) or (D,)    [pre-transposed vs. PyTorch nn.Linear]
    w2: (D, C), b2: (1, C) or (C,)
    """
    if dropout:
        # TODO(synk): Dropout(0.25) branch not implemented (module default is False).
        raise NotImplementedError("Attn_Net dropout=True branch not implemented")

    N, L = x.shape
    D = w1.shape[1]
    C = w2.shape[1]

    tile_n = _choose_tile_n(N, tile_n)
    grid = (pl.cdiv(N, tile_n),)

    # Resident operands (tiny, constant index_map -> fetched once):
    w1_in = w1.astype(jnp.bfloat16)                    # (L, D) bf16 for the MXU
    b1_in = b1.astype(jnp.float32).reshape(1, D)       # (1, D)
    w2t_in = jnp.transpose(w2).astype(jnp.float32)     # (C, D)
    b2_in = b2.astype(jnp.float32).reshape(C, 1)       # (C, 1)

    # VMEM budget @ tile_n=2048, L=1024, f32 x: 16 MiB x double-buffer +
    # ~1 MiB W1 + ~2 MiB f32 h + small out  ~= 19-20 MiB.  Raise the scoped
    # limit so v5e's 16 MiB default accepts it; 32 MiB is within every
    # generation's physical VMEM (v7x: 64 MiB).
    vmem_limit = 32 * 1024 * 1024

    a_t = pl.pallas_call(
        _attn_net_kernel,
        out_shape=jax.ShapeDtypeStruct((C, N), x.dtype),     # lane-dense layout
        grid_spec=pltpu.PrefetchScalarGridSpec(
            num_scalar_prefetch=0,
            grid=grid,
            in_specs=[
                pl.BlockSpec((tile_n, L), lambda i: (i, 0)),   # x tile (pipelined)
                pl.BlockSpec((L, D), lambda i: (0, 0)),        # W1 (resident)
                pl.BlockSpec((1, D), lambda i: (0, 0)),        # b1
                pl.BlockSpec((C, D), lambda i: (0, 0)),        # W2^T
                pl.BlockSpec((C, 1), lambda i: (0, 0)),        # b2
            ],
            out_specs=pl.BlockSpec((C, tile_n), lambda i: (0, i)),
        ),
        compiler_params=pltpu.CompilerParams(
            dimension_semantics=("parallel",),
            vmem_limit_bytes=vmem_limit,
        ),
    )(x, w1_in, b1_in, w2t_in, b2_in)

    # (C, N) -> (N, C): negligible (C is 1..few) vs. the (N, L) input read.
    a = jnp.transpose(a_t)
    # forward returns (attention logits, original input x) -- x is a passthrough.
    return a, x


if __name__ == "__main__":
    # Module defaults: L=1024, D=256, n_classes=1 (dropout=False).
    L, D = 1024, 256

    key = jax.random.PRNGKey(0)

    # Two configs: (small bag, 1 class) exercises the single exact tile;
    # (1200 rows, 3 classes) exercises a 2-step grid with a ragged last tile.
    for (N, C) in [(100, 1), (1200, 3)]:
        kx, k1, kb1, k2, kb2, key = jax.random.split(key, 6)
        x = jax.random.normal(kx, (N, L), dtype=jnp.float32)
        # Deterministic synthetic parameters (roughly nn.Linear-scale init).
        w1 = jax.random.uniform(k1, (L, D), minval=-1.0, maxval=1.0) * (1.0 / (L ** 0.5))
        b1 = jax.random.uniform(kb1, (1, D), minval=-1.0, maxval=1.0) * (1.0 / (L ** 0.5))
        w2 = jax.random.uniform(k2, (D, C), minval=-1.0, maxval=1.0) * (1.0 / (D ** 0.5))
        b2 = jax.random.uniform(kb2, (1, C), minval=-1.0, maxval=1.0) * (1.0 / (D ** 0.5))

        a, x_out = attn_net_forward(x, w1, b1, w2, b2)
        a = jax.block_until_ready(a)
        x_out = jax.block_until_ready(x_out)

        # Pure-JAX f32 reference; bf16 MXU inputs -> slightly looser tolerance.
        h_ref = jnp.tanh(x @ w1 + b1)
        a_ref = h_ref @ w2 + b2
        assert a.shape == (N, C), a.shape
        assert x_out.shape == (N, L), x_out.shape
        max_err = float(jnp.max(jnp.abs(a - a_ref)))
        assert jnp.allclose(a, a_ref, atol=3e-2, rtol=3e-2), max_err
        assert jnp.array_equal(x_out, x)

    print("KERNEL_OK")
</pallas_src>

<mosaic_0001>
module attributes {stable_mosaic.version = 11 : i64} {
  func.func @_attn_net_kernel(%arg0: i32, %arg1: memref<100x1024xf32, #tpu.memory_space<vmem>>, %arg2: memref<1024x256xbf16, #tpu.memory_space<vmem>>, %arg3: memref<1x256xf32, #tpu.memory_space<vmem>>, %arg4: memref<1x256xf32, #tpu.memory_space<vmem>>, %arg5: memref<1x1xf32, #tpu.memory_space<vmem>>, %arg6: memref<1x100xf32, #tpu.memory_space<vmem>>) attributes {dimension_semantics = [#tpu.dimension_semantics<parallel>], iteration_bounds = array<i64: 1>, scalar_prefetch = 0 : i64, scratch_operands = 0 : i64, tpu.core_type = #tpu.core_type<tc>, window_params = [{transform_indices = @transform_0, window_bounds = array<i64: 100, 1024>}, {pipeline_mode = #tpu.pipeline_mode<synchronous>, transform_indices = @transform_1, window_bounds = array<i64: 1024, 256>}, {pipeline_mode = #tpu.pipeline_mode<synchronous>, transform_indices = @transform_2, window_bounds = array<i64: 1, 256>}, {pipeline_mode = #tpu.pipeline_mode<synchronous>, transform_indices = @transform_3, window_bounds = array<i64: 1, 256>}, {pipeline_mode = #tpu.pipeline_mode<synchronous>, transform_indices = @transform_4, window_bounds = array<i64: 1, 1>}, {transform_indices = @transform_5, window_bounds = array<i64: 1, 100>}]} {
    %c0 = arith.constant 0 : index
    %c0_0 = arith.constant 0 : index
    %0 = vector.load %arg1[%c0, %c0_0] : memref<100x1024xf32, #tpu.memory_space<vmem>>, vector<100x1024xf32>
    %1 = arith.truncf %0 : vector<100x1024xf32> to vector<100x1024xbf16>
    %c0_1 = arith.constant 0 : index
    %c0_2 = arith.constant 0 : index
    %2 = vector.load %arg2[%c0_1, %c0_2] : memref<1024x256xbf16, #tpu.memory_space<vmem>>, vector<1024x256xbf16>
    %cst = arith.constant dense<0.000000e+00> : vector<100x256xf32>
    %3 = tpu.matmul %1, %2, %cst {dimension_numbers = #tpu.dot_dimension_numbers<[1], [0], [0], [1], [0, 0, 1, 1], [], []>} : vector<100x1024xbf16>, vector<1024x256xbf16>, vector<100x256xf32> -> vector<100x256xf32>
    %c0_3 = arith.constant 0 : index
    %c0_4 = arith.constant 0 : index
    %4 = vector.load %arg3[%c0_3, %c0_4] : memref<1x256xf32, #tpu.memory_space<vmem>>, vector<1x256xf32>
    %5 = vector.broadcast %4 : vector<1x256xf32> to vector<100x256xf32>
    %6 = arith.addf %3, %5 : vector<100x256xf32>
    %7 = math.tanh %6 : vector<100x256xf32>
    %c0_5 = arith.constant 0 : index
    %c0_6 = arith.constant 0 : index
    %8 = vector.load %arg4[%c0_5, %c0_6] : memref<1x256xf32, #tpu.memory_space<vmem>>, vector<1x256xf32>
    "tpu.trace_start"() <{level = 10 : i32, message = "cd,nd->cn"}> : () -> ()
    %cst_7 = arith.constant dense<0.000000e+00> : vector<1x100xf32>
    %9 = tpu.matmul %8, %7, %cst_7 {dimension_numbers = #tpu.dot_dimension_numbers<[1], [1], [0], [0], [0, 0, 1, 0], [], []>} : vector<1x256xf32>, vector<100x256xf32>, vector<1x100xf32> -> vector<1x100xf32>
    "tpu.trace_stop"() : () -> ()
    %c0_8 = arith.constant 0 : index
    %c0_9 = arith.constant 0 : index
    %10 = vector.load %arg5[%c0_8, %c0_9] : memref<1x1xf32, #tpu.memory_space<vmem>>, vector<1x1xf32>
    %11 = vector.broadcast %10 : vector<1x1xf32> to vector<1x100xf32>
    %12 = arith.addf %9, %11 : vector<1x100xf32>
    %c0_10 = arith.constant 0 : index
    %c0_11 = arith.constant 0 : index
    %13 = vector.load %arg6[%c0_10, %c0_11] : memref<1x100xf32, #tpu.memory_space<vmem>>, vector<1x100xf32>
    tpu.vector_store %arg6[%c0_10, %c0_11], %12 {strides = array<i32>} : memref<1x100xf32, #tpu.memory_space<vmem>>, vector<1x100xf32>,
    return
  }
  func.func @transform_0(%arg0: i32) -> (i32, i32) {
    %c0_i32 = arith.constant 0 : i32
    %c0_i32_0 = arith.constant 0 : i32
    return %arg0, %c0_i32 : i32, i32
  }
  func.func @transform_1(%arg0: i32) -> (i32, i32) {
    %c0_i32 = arith.constant 0 : i32
    %c0_i32_0 = arith.constant 0 : i32
    %c0_i32_1 = arith.constant 0 : i32
    return %c0_i32, %c0_i32_0 : i32, i32
  }
  func.func @transform_2(%arg0: i32) -> (i32, i32) {
    %c0_i32 = arith.constant 0 : i32
    %c0_i32_0 = arith.constant 0 : i32
    %c0_i32_1 = arith.constant 0 : i32
    return %c0_i32, %c0_i32_0 : i32, i32
  }
  func.func @transform_3(%arg0: i32) -> (i32, i32) {
    %c0_i32 = arith.constant 0 : i32
    %c0_i32_0 = arith.constant 0 : i32
    %c0_i32_1 = arith.constant 0 : i32
    return %c0_i32, %c0_i32_0 : i32, i32
  }
  func.func @transform_4(%arg0: i32) -> (i32, i32) {
    %c0_i32 = arith.constant 0 : i32
    %c0_i32_0 = arith.constant 0 : i32
    %c0_i32_1 = arith.constant 0 : i32
    return %c0_i32, %c0_i32_0 : i32, i32
  }
  func.func @transform_5(%arg0: i32) -> (i32, i32) {
    %c0_i32 = arith.constant 0 : i32
    %c0_i32_0 = arith.constant 0 : i32
    return %c0_i32, %arg0 : i32, i32
  }
}

</mosaic_0001>

<bundles_post_ra>
// kernel: tpu_custom_call.1
= control target key start
LH: loop header
LB: loop body
LE: loop exit
PB: predicated region body
PF: predicated region fallthrough
CT: control target
= control target key end

     0   :  { %s2238_s0 = inlined_call_operand.hbm [shape: f32[100,1024], index: 0, kind: input, shape index: {}]   ;;  %s2239_s1 = inlined_call_operand.hbm [shape: bf16[1024,256], index: 1, kind: input, shape index: {}]   ;;  %s2240_s2 = inlined_call_operand.vmem [shape: f32[1,256], index: 2, kind: input, shape index: {}]   ;;  %s2241_s3 = inlined_call_operand.vmem [shape: f32[1,256], index: 3, kind: input, shape index: {}]   ;;  %s2242_s4 = inlined_call_operand.<no memory space> [shape: f32[1,1], index: 4, kind: input, shape index: {}]   ;;  %s2243_s5 = inlined_call_operand.hbm [shape: f32[1,100], index: 5, kind: output, shape index: {}]  }
   0x1   :  { %v10_v0 = vstv %s2242_s4 }
   0x2   :  { %11 = vst [vmem:[#allocation2] sm:$0x1] %v10_v0 }
   0x3   :  { %12 = vsyncpa [#allocation4], 0 }
   0x4   :  { %13 = vsyncpa [#allocation7], 0 }
   0x5   :  { %14 = vsyncpa [#allocation5], 0  ;;  %s2116_s20 = smov [#allocation3]   ;;  %s2044_s24 = scalar_lea.hbm %s2238_s0, 13312 }
   0x6   :  { %s20_s21 = sshll.u32 %s2116_s20, 4  ;;  %p2045_p0 = scmp.ne.s32.totalorder %s2238_s0, %s2044_s24  ;;  %s21_s21 = int_to_ptr.vmem [resolvable:$true] %s20_s21 }
   0x7   :  { %p2048_p1 = scmp.lt.u32.totalorder %s2044_s24, %s2238_s0 }
   0x9   :  { %p2050_p2 = pnand %p2048_p1, %p2045_p0 }
   0xb   :  { %2053 = shalt.err (!%p2050_p2)
}
   0xc   :  { %s2054_s4 = scalar_lea.vmem %s21_s21, 13312  ;;  %p2059_p4 = scmp.lt.s32.totalorder %s21_s21, %s21_s21 }
   0xd   :  { %p2055_p3 = scmp.ne.s32.totalorder %s21_s21, %s2054_s4  ;;  %p2060_p5 = scmp.lt.s32.totalorder %s2054_s4, %s2054_s4 }
   0xf   :  { %p2061_p6 = por %p2060_p5, %p2059_p4 }
  0x11   :  { %p2062_p7 = pnand %p2061_p6, %p2055_p3 }
  0x13   :  { %2065 = shalt.err (!%p2062_p7)
}
  0x14   :  { %s2117_s29 = smov 1024   ;;  %s2118_s30 = smov 64  }
  0x15   :  { %26 = dma.hbm_to_vmem [thread:$0]  %s2238_s0, 13312, %s21_s21, [#allocation4], %s2117_s29, %s2117_s29, %s2118_s30  }
  0x16   :  { %s2119_s8 = smov [#allocation6]   ;;  %s2066_s12 = scalar_lea.hbm %s2239_s1, 16384 }
  0x17   :  { %s32_s9 = sshll.u32 %s2119_s8, 4  ;;  %p2067_p8 = scmp.ne.s32.totalorder %s2239_s1, %s2066_s12  ;;  %s33_s9 = int_to_ptr.vmem [resolvable:$true] %s32_s9 }
  0x18   :  { %p2070_p9 = scmp.lt.u32.totalorder %s2066_s12, %s2239_s1 }
  0x1a   :  { %p2072_p10 = pnand %p2070_p9, %p2067_p8 }
  0x1c   :  { %2075 = shalt.err (!%p2072_p10)
}
  0x1d   :  { %s2076_s17 = scalar_lea.vmem %s33_s9, 16384  ;;  %p2081_p12 = scmp.lt.s32.totalorder %s33_s9, %s33_s9 }
  0x1e   :  { %p2077_p11 = scmp.ne.s32.totalorder %s33_s9, %s2076_s17  ;;  %p2082_p13 = scmp.lt.s32.totalorder %s2076_s17, %s2076_s17 }
  0x20   :  { %p2083_p0 = por %p2082_p13, %p2081_p12 }
  0x22   :  { %p2084_p1 = pnand %p2083_p0, %p2077_p11 }
  0x24   :  { %2087 = shalt.err (!%p2084_p1)
}
  0x25   :  { %s2120_s0 = smov 128   ;;  %s2121_s18 = smov 8  }
  0x26   :  { %38 = dma.hbm_to_vmem [thread:$0]  %s2239_s1, 16384, %s33_s9, [#allocation7], %s2120_s0, %s2120_s0, %s2121_s18  }
  0x27   :  { %2110 = dma.done.wait [#allocation4], 13312  }
  0x28   :  { %2111 = vsyncadd [#allocation4], 4294953984 }
  0x29   :  { %2112 = dma.done.wait [#allocation7], 16384  }
  0x2a   :  { %2113 = vsyncadd [#allocation7], 4294950912  ;;  %v1800_v1 = vld [vmem:[#allocation6 + $0x4] ss:$8 sps:$4 sm:$0xff]   ;;  %v1804_v3 = vld [vmem:[#allocation6] ss:$8 sps:$4 sm:$0xff]  }
  0x2b   :  { %v1802_v2 = vld [vmem:[#allocation6 + $0x204] ss:$8 sps:$4 sm:$0xff]   ;;  %991 = vmatprep.subr.bf16.mxu1 %v1800_v1  ;;  %v1805_v4 = vld [vmem:[#allocation6 + $0x200] ss:$8 sps:$4 sm:$0xff]   ;;  %v1806_v5 = vld [vmem:[#allocation6 + $0x14] ss:$8 sps:$4 sm:$0xff]  }
  0x2c   :  { %1193 = vmatprep.subr.bf16.mxu0 %v1802_v2  ;;  %992 = vmatpush1.bf16.msra.mxu1 %v1804_v3  ;;  %v1808_v6 = vld [vmem:[#allocation6 + $0x214] ss:$8 sps:$4 sm:$0xff]   ;;  %v1810_v7 = vld [vmem:[#allocation6 + $0x10] ss:$8 sps:$4 sm:$0xff]   ;;  %v1812_v9 = vld [vmem:[#allocation6 + $0x24] ss:$8 sps:$4 sm:$0xff]  }
  0x2d   :  { %1194 = vmatpush1.bf16.msra.mxu0 %v1805_v4  ;;  %993 = vmatprep.subr.bf16.mxu1 %v1806_v5  ;;  %v1811_v8 = vld [vmem:[#allocation6 + $0x210] ss:$8 sps:$4 sm:$0xff]   ;;  %v1814_v10 = vld [vmem:[#allocation6 + $0x224] ss:$8 sps:$4 sm:$0xff]   ;;  %v1816_v11 = vld [vmem:[#allocation6 + $0x20] ss:$8 sps:$4 sm:$0xff]  }
  0x2e   :  { %1195 = vmatprep.subr.bf16.mxu0 %v1808_v6  ;;  %v1817_v12 = vld [vmem:[#allocation6 + $0x220] ss:$8 sps:$4 sm:$0xff]   ;;  %v1818_v13 = vld [vmem:[#allocation6 + $0x34] ss:$8 sps:$4 sm:$0xff]   ;;  %v1822_v15 = vld [vmem:[#allocation6 + $0x30] ss:$8 sps:$4 sm:$0xff]  }
  0x2f   :  { %v1820_v14 = vld [vmem:[#allocation6 + $0x234] ss:$8 sps:$4 sm:$0xff]   ;;  %v1823_v16 = vld [vmem:[#allocation6 + $0x230] ss:$8 sps:$4 sm:$0xff]   ;;  %v1824_v17 = vld [vmem:[#allocation6 + $0x44] ss:$8 sps:$4 sm:$0xff]  }
  0x30   :  { %994 = vmatpush1.bf16.msra.mxu1 %v1810_v7  ;;  %v1826_v18 = vld [vmem:[#allocation6 + $0x244] ss:$8 sps:$4 sm:$0xff]   ;;  %v1828_v19 = vld [vmem:[#allocation6 + $0x40] ss:$8 sps:$4 sm:$0xff]   ;;  %v1830_v21 = vld [vmem:[#allocation6 + $0x54] ss:$8 sps:$4 sm:$0xff]  }
  0x31   :  { %1196 = vmatpush1.bf16.msra.mxu0 %v1811_v8  ;;  %995 = vmatprep.subr.bf16.mxu1 %v1812_v9  ;;  %v1829_v20 = vld [vmem:[#allocation6 + $0x240] ss:$8 sps:$4 sm:$0xff]   ;;  %v1832_v22 = vld [vmem:[#allocation6 + $0x254] ss:$8 sps:$4 sm:$0xff]   ;;  %v1834_v23 = vld [vmem:[#allocation6 + $0x50] ss:$8 sps:$4 sm:$0xff]  }
  0x32   :  { %1197 = vmatprep.subr.bf16.mxu0 %v1814_v10  ;;  %v1835_v24 = vld [vmem:[#allocation6 + $0x250] ss:$8 sps:$4 sm:$0xff]   ;;  %v1836_v25 = vld [vmem:[#allocation6 + $0x64] ss:$8 sps:$4 sm:$0xff]   ;;  %v1840_v27 = vld [vmem:[#allocation6 + $0x60] ss:$8 sps:$4 sm:$0xff]  }
  0x33   :  { %v1838_v26 = vld [vmem:[#allocation6 + $0x264] ss:$8 sps:$4 sm:$0xff]   ;;  %v1841_v28 = vld [vmem:[#allocation6 + $0x260] ss:$8 sps:$4 sm:$0xff]   ;;  %v1842_v29 = vld [vmem:[#allocation6 + $0x74] ss:$8 sps:$4 sm:$0xff]  }
  0x34   :  { %996 = vmatpush1.bf16.msra.mxu1 %v1816_v11  ;;  %v1844_v30 = vld [vmem:[#allocation6 + $0x274] ss:$8 sps:$4 sm:$0xff]   ;;  %v1846_v31 = vld [vmem:[#allocation6 + $0x70] ss:$8 sps:$4 sm:$0xff]   ;;  %v1848_v33 = vld [vmem:[#allocation6 + $0x84] ss:$8 sps:$4 sm:$0xff]  }
  0x35   :  { %1198 = vmatpush1.bf16.msra.mxu0 %v1817_v12  ;;  %997 = vmatprep.subr.bf16.mxu1 %v1818_v13  ;;  %v1847_v32 = vld [vmem:[#allocation6 + $0x270] ss:$8 sps:$4 sm:$0xff]   ;;  %v1850_v34 = vld [vmem:[#allocation6 + $0x284] ss:$8 sps:$4 sm:$0xff]   ;;  %v1852_v35 = vld [vmem:[#allocation6 + $0x80] ss:$8 sps:$4 sm:$0xff]  }
  0x36   :  { %1199 = vmatprep.subr.bf16.mxu0 %v1820_v14  ;;  %v1853_v36 = vld [vmem:[#allocation6 + $0x280] ss:$8 sps:$4 sm:$0xff]   ;;  %v1854_v37 = vld [vmem:[#allocation6 + $0x94] ss:$8 sps:$4 sm:$0xff]   ;;  %v1858_v39 = vld [vmem:[#allocation6 + $0x90] ss:$8 sps:$4 sm:$0xff]  }
  0x37   :  { %v1856_v38 = vld [vmem:[#allocation6 + $0x294] ss:$8 sps:$4 sm:$0xff]   ;;  %v1859_v40 = vld [vmem:[#allocation6 + $0x290] ss:$8 sps:$4 sm:$0xff]   ;;  %v1860_v41 = vld [vmem:[#allocation6 + $0xa4] ss:$8 sps:$4 sm:$0xff]  }
  0x38   :  { %998 = vmatpush1.bf16.msra.mxu1 %v1822_v15  ;;  %v1862_v42 = vld [vmem:[#allocation6 + $0x2a4] ss:$8 sps:$4 sm:$0xff]   ;;  %v1864_v43 = vld [vmem:[#allocation6 + $0xa0] ss:$8 sps:$4 sm:$0xff]   ;;  %v1866_v45 = vld [vmem:[#allocation6 + $0xb4] ss:$8 sps:$4 sm:$0xff]  }
  0x39   :  { %1200 = vmatpush1.bf16.msra.mxu0 %v1823_v16  ;;  %999 = vmatprep.subr.bf16.mxu1 %v1824_v17  ;;  %v1865_v44 = vld [vmem:[#allocation6 + $0x2a0] ss:$8 sps:$4 sm:$0xff]   ;;  %v1868_v46 = vld [vmem:[#allocation6 + $0x2b4] ss:$8 sps:$4 sm:$0xff]   ;;  %v1870_v47 = vld [vmem:[#allocation6 + $0xb0] ss:$8 sps:$4 sm:$0xff]  }
  0x3a   :  { %1201 = vmatprep.subr.bf16.mxu0 %v1826_v18  ;;  %v1871_v48 = vld [vmem:[#allocation6 + $0x2b0] ss:$8 sps:$4 sm:$0xff]   ;;  %v52_v49 = vld [vmem:[#allocation3 + $0x8] sm:$0xff]  ;;  %v1878_v59 = vld [vmem:[#allocation6 + $0xd4] ss:$8 sps:$4 sm:$0xff]   ;;  %vm1513_vm0 = vcmask 811008  }
  0x3b   :  { %v60_v50 = vld [vmem:[#allocation3 + $0x48] sm:$0xff]  ;;  %v1880_v60 = vld [vmem:[#allocation6 + $0x2d4] ss:$8 sps:$4 sm:$0xff]   ;;  %v1882_v61 = vld [vmem:[#allocation6 + $0xd0] ss:$8 sps:$4 sm:$0xff]  }
  0x3c   :  { %1000 = vmatpush1.bf16.msra.mxu1 %v1828_v19  ;;  %v1872_v51 = vld [vmem:[#allocation6 + $0xc4] ss:$8 sps:$4 sm:$0xff]   ;;  %v156_v53 = vpack.c.bf16 %v60_v50, %v52_v49  ;;  %v1876_v57 = vld [vmem:[#allocation6 + $0xc0] ss:$8 sps:$4 sm:$0xff]   ;;  %v1883_v62 = vld [vmem:[#allocation6 + $0x2d0] ss:$8 sps:$4 sm:$0xff]  }
  0x3d   :  { %1202 = vmatpush1.bf16.msra.mxu0 %v1829_v20  ;;  %1001 = vmatprep.subr.bf16.mxu1 %v1830_v21  ;;  %v1874_v52 = vld [vmem:[#allocation6 + $0x2c4] ss:$8 sps:$4 sm:$0xff]   ;;  %v1877_v58 = vld [vmem:[#allocation6 + $0x2c0] ss:$8 sps:$4 sm:$0xff]   ;;  %v1890_v3 = vld [vmem:[#allocation6 + $0xf4] ss:$8 sps:$4 sm:$0xff]  }
  0x3e   :  { %1203 = vmatprep.subr.bf16.mxu0 %v1832_v22  ;;  %v56_v54 = vld [vmem:[#allocation3 + $0x28] sm:$0xff]  ;;  %1023 = vmatprep.mubr.bf16.mxu1 %v156_v53  ;;  %v1892_v4 = vld [vmem:[#allocation6 + $0x2f4] ss:$8 sps:$4 sm:$0xff]   ;;  %v1894_v5 = vld [vmem:[#allocation6 + $0xf0] ss:$8 sps:$4 sm:$0xff]  }
  0x3f   :  { %v64_v55 = vld [vmem:[#allocation3 + $0x68] sm:$0xff]  ;;  %v1895_v6 = vld [vmem:[#allocation6 + $0x2f0] ss:$8 sps:$4 sm:$0xff]   ;;  %v51_v8 = vld [vmem:[#allocation3] sm:$0xff] }
  0x40   :  { %1002 = vmatpush1.bf16.msra.mxu1 %v1834_v23  ;;  %v160_v56 = vpack.c.bf16 %v64_v55, %v56_v54  ;;  %v1884_v63 = vld [vmem:[#allocation6 + $0xe4] ss:$8 sps:$4 sm:$0xff]   ;;  %v1888_v1 = vld [vmem:[#allocation6 + $0xe0] ss:$8 sps:$4 sm:$0xff]   ;;  %v1904_v21 = vld [vmem:[#allocation6 + $0x114] ss:$8 sps:$4 sm:$0xff]  }
  0x41   :  { %1204 = vmatpush1.bf16.msra.mxu0 %v1835_v24  ;;  %1003 = vmatprep.subr.bf16.mxu1 %v1836_v25  ;;  %v1886_v0 = vld [vmem:[#allocation6 + $0x2e4] ss:$8 sps:$4 sm:$0xff]   ;;  %v1889_v2 = vld [vmem:[#allocation6 + $0x2e0] ss:$8 sps:$4 sm:$0xff]   ;;  %v1907_v22 = vld [vmem:[#allocation6 + $0x314] ss:$8 sps:$4 sm:$0xff]  }
  0x42   :  { %1205 = vmatprep.subr.bf16.mxu0 %v1838_v26  ;;  %1225 = vmatprep.mubr.bf16.mxu0 %v160_v56  ;;  %v1898_v7 = vld [vmem:[#allocation6 + $0x104] ss:$8 sps:$4 sm:$0xff]   ;;  %v1896_v19 = vld [vmem:[#allocation6 + $0x100] ss:$8 sps:$4 sm:$0xff]   ;;  %v1902_v23 = vld [vmem:[#allocation6 + $0x110] ss:$8 sps:$4 sm:$0xff]  }
  0x43   :  { %v59_v9 = vld [vmem:[#allocation3 + $0x40] sm:$0xff]  ;;  %v68_v13 = vld [vmem:[#allocation3 + $0x88] sm:$0xff]  ;;  %v1905_v24 = vld [vmem:[#allocation6 + $0x310] ss:$8 sps:$4 sm:$0xff]  }
  0x44   :  { %1004 = vmatpush1.bf16.msra.mxu1 %v1840_v27  ;;  %v55_v10 = vld [vmem:[#allocation3 + $0x20] sm:$0xff]  ;;  %v76_v14 = vld [vmem:[#allocation3 + $0xc8] sm:$0xff]  ;;  %v155_v15 = vpack.c.bf16 %v59_v9, %v51_v8 }
  0x45   :  { %1206 = vmatpush1.bf16.msra.mxu0 %v1841_v28  ;;  %1005 = vmatprep.subr.bf16.mxu1 %v1842_v29  ;;  %v63_v11 = vld [vmem:[#allocation3 + $0x60] sm:$0xff]  ;;  %v72_v17 = vld [vmem:[#allocation3 + $0xa8] sm:$0xff]  ;;  %v164_v25 = vpack.c.bf16 %v76_v14, %v68_v13 }
  0x46   :  { %1207 = vmatprep.subr.bf16.mxu0 %v1844_v30  ;;  %v1901_v12 = vld [vmem:[#allocation6 + $0x304] ss:$8 sps:$4 sm:$0xff]   ;;  %v159_v16 = vpack.c.bf16 %v63_v11, %v55_v10  ;;  %v1899_v20 = vld [vmem:[#allocation6 + $0x300] ss:$8 sps:$4 sm:$0xff]  }
  0x47   :  { %v80_v18 = vld [vmem:[#allocation3 + $0xe8] sm:$0xff]  ;;  %v67_v28 = vld [vmem:[#allocation3 + $0x80] sm:$0xff] }
  0x48   :  { %1006 = vmatpush1.bf16.msra.mxu1 %v1846_v31  ;;  %v168_v26 = vpack.c.bf16 %v80_v18, %v72_v17  ;;  %v1910_v27 = vld [vmem:[#allocation6 + $0x124] ss:$8 sps:$4 sm:$0xff]   ;;  %v1940_v17 = vld [vmem:[#allocation6 + $0x174] ss:$8 sps:$4 sm:$0xff]  }
  0x49   :  { %1208 = vmatpush1.bf16.msra.mxu0 %v1847_v32  ;;  %1007 = vmatprep.subr.bf16.mxu1 %v1848_v33  ;;  %v75_v29 = vld [vmem:[#allocation3 + $0xc0] sm:$0xff]  ;;  %v84_v33 = vld [vmem:[#allocation3 + $0x108] sm:$0xff]  ;;  %v1943_v18 = vld [vmem:[#allocation6 + $0x374] ss:$8 sps:$4 sm:$0xff]  }
  0x4a   :  { %1209 = vmatprep.subr.bf16.mxu0 %v1850_v34  ;;  %v71_v30 = vld [vmem:[#allocation3 + $0xa0] sm:$0xff]  ;;  %v92_v34 = vld [vmem:[#allocation3 + $0x148] sm:$0xff] }
  0x4b   :  { %v79_v31 = vld [vmem:[#allocation3 + $0xe0] sm:$0xff]  ;;  %v100_v53 = vld [vmem:[#allocation3 + $0x188] sm:$0xff] }
  0x4c   :  { %1008 = vmatpush1.bf16.msra.mxu1 %v1852_v35  ;;  %v1913_v32 = vld [vmem:[#allocation6 + $0x324] ss:$8 sps:$4 sm:$0xff]   ;;  %v163_v35 = vpack.c.bf16 %v75_v29, %v67_v28 }
  0x4d   :  { %1210 = vmatpush1.bf16.msra.mxu0 %v1853_v36  ;;  %1009 = vmatprep.subr.bf16.mxu1 %v1854_v37  ;;  %v167_v36 = vpack.c.bf16 %v79_v31, %v71_v30  ;;  %v88_v37 = vld [vmem:[#allocation3 + $0x128] sm:$0xff]  ;;  %v91_v49 = vld [vmem:[#allocation3 + $0x140] sm:$0xff] }
  0x4e   :  { %1211 = vmatprep.subr.bf16.mxu0 %v1856_v38  ;;  %v96_v38 = vld [vmem:[#allocation3 + $0x168] sm:$0xff]  ;;  %v87_v50 = vld [vmem:[#allocation3 + $0x120] sm:$0xff] }
  0x4f   :  { %v108_v54 = vld [vmem:[#allocation3 + $0x1c8] sm:$0xff] }
  0x50   :  { %1010 = vmatpush1.bf16.msra.mxu1 %v1858_v39  ;;  %v1908_v39 = vld [vmem:[#allocation6 + $0x120] ss:$8 sps:$4 sm:$0xff]   ;;  %v1937_v8 = vld [vmem:[#allocation6 + $0x364] ss:$8 sps:$4 sm:$0xff]  }
  0x51   :  { %1212 = vmatpush1.bf16.msra.mxu0 %v1859_v40  ;;  %1011 = vmatprep.subr.bf16.mxu1 %v1860_v41  ;;  %v1911_v40 = vld [vmem:[#allocation6 + $0x320] ss:$8 sps:$4 sm:$0xff]   ;;  %v1916_v41 = vld [vmem:[#allocation6 + $0x134] ss:$8 sps:$4 sm:$0xff]   ;;  %v1949_v28 = vld [vmem:[#allocation6 + $0x384] ss:$8 sps:$4 sm:$0xff]  }
  0x52   :  { %1213 = vmatprep.subr.bf16.mxu0 %v1862_v42  ;;  %v1919_v42 = vld [vmem:[#allocation6 + $0x334] ss:$8 sps:$4 sm:$0xff]   ;;  %v116_v9 = vld [vmem:[#allocation3 + $0x208] sm:$0xff] }
  0x53   :  { %v124_v10 = vld [vmem:[#allocation3 + $0x248] sm:$0xff] }
  0x54   :  { %1012 = vmatpush1.bf16.msra.mxu1 %v1864_v43  ;;  %v1914_v43 = vld [vmem:[#allocation6 + $0x130] ss:$8 sps:$4 sm:$0xff]   ;;  %v120_v13 = vld [vmem:[#allocation3 + $0x228] sm:$0xff] }
  0x55   :  { %1214 = vmatpush1.bf16.msra.mxu0 %v1865_v44  ;;  %1013 = vmatprep.subr.bf16.mxu1 %v1866_v45  ;;  %v1917_v44 = vld [vmem:[#allocation6 + $0x330] ss:$8 sps:$4 sm:$0xff]   ;;  %v172_v45 = vpack.c.bf16 %v92_v34, %v84_v33  ;;  %v128_v14 = vld [vmem:[#allocation3 + $0x268] sm:$0xff] }
  0x56   :  { %1215 = vmatprep.subr.bf16.mxu0 %v1868_v46  ;;  %v176_v46 = vpack.c.bf16 %v96_v38, %v88_v37  ;;  %v132_v29 = vld [vmem:[#allocation3 + $0x288] sm:$0xff]  ;;  %v1952_v37 = vld [vmem:[#allocation6 + $0x194] ss:$8 sps:$4 sm:$0xff]  }
  0x57   :  { %v140_v30 = vld [vmem:[#allocation3 + $0x2c8] sm:$0xff]  ;;  %v1955_v38 = vld [vmem:[#allocation6 + $0x394] ss:$8 sps:$4 sm:$0xff]  }
  0x58   :  { %1014 = vmatpush1.bf16.msra.mxu1 %v1870_v47  ;;  %v1922_v47 = vld [vmem:[#allocation6 + $0x144] ss:$8 sps:$4 sm:$0xff]  }
  0x59   :  { %1216 = vmatpush1.bf16.msra.mxu0 %v1871_v48  ;;  %1015 = vmatprep.subr.bf16.mxu1 %v1872_v51  ;;  %v83_v48 = vld [vmem:[#allocation3 + $0x100] sm:$0xff]  ;;  %v136_v33 = vld [vmem:[#allocation3 + $0x2a8] sm:$0xff] }
  0x5a   :  { %1217 = vmatprep.subr.bf16.mxu0 %v1874_v52  ;;  %v95_v51 = vld [vmem:[#allocation3 + $0x160] sm:$0xff]  ;;  %v171_v55 = vpack.c.bf16 %v91_v49, %v83_v48  ;;  %v144_v34 = vld [vmem:[#allocation3 + $0x2e8] sm:$0xff] }
  0x5b   :  { %v1925_v52 = vld [vmem:[#allocation6 + $0x344] ss:$8 sps:$4 sm:$0xff]   ;;  %v175_v56 = vpack.c.bf16 %v95_v51, %v87_v50  ;;  %v148_v51 = vld [vmem:[#allocation3 + $0x308] sm:$0xf] }
  0x5c   :  { %1016 = vmatpush1.bf16.msra.mxu1 %v1876_v57  ;;  %v104_v57 = vld [vmem:[#allocation3 + $0x1a8] sm:$0xff] }
  0x5d   :  { %1218 = vmatpush1.bf16.msra.mxu0 %v1877_v58  ;;  %1017 = vmatprep.subr.bf16.mxu1 %v1878_v59  ;;  %v112_v58 = vld [vmem:[#allocation3 + $0x1e8] sm:$0xff] }
  0x5e   :  { %1219 = vmatprep.subr.bf16.mxu0 %v1880_v60  ;;  %v1920_v59 = vld [vmem:[#allocation6 + $0x140] ss:$8 sps:$4 sm:$0xff]   ;;  %v1961_v48 = vld [vmem:[#allocation6 + $0x3a4] ss:$8 sps:$4 sm:$0xff]  }
  0x5f   :  { %v1923_v60 = vld [vmem:[#allocation6 + $0x340] ss:$8 sps:$4 sm:$0xff]  }
  0x60   :  { %1018 = vmatpush1.bf16.msra.mxu1 %v1882_v61  ;;  %v1928_v61 = vld [vmem:[#allocation6 + $0x154] ss:$8 sps:$4 sm:$0xff]  }
  0x61   :  { %1220 = vmatpush1.bf16.msra.mxu0 %v1883_v62  ;;  %1019 = vmatprep.subr.bf16.mxu1 %v1884_v63  ;;  %v1931_v62 = vld [vmem:[#allocation6 + $0x354] ss:$8 sps:$4 sm:$0xff]   ;;  %v1926_v63 = vld [vmem:[#allocation6 + $0x150] ss:$8 sps:$4 sm:$0xff]  }
  0x62   :  { %1221 = vmatprep.subr.bf16.mxu0 %v1886_v0  ;;  %v1929_v0 = vld [vmem:[#allocation6 + $0x350] ss:$8 sps:$4 sm:$0xff]  }
  0x64   :  { %1020 = vmatpush1.bf16.msra.mxu1 %v1888_v1  ;;  %v180_v1 = vpack.c.bf16 %v108_v54, %v100_v53  ;;  %v1956_v53 = vld [vmem:[#allocation6 + $0x1a0] ss:$8 sps:$4 sm:$0xff]  }
  0x65   :  { %1222 = vmatpush1.bf16.msra.mxu0 %v1889_v2  ;;  %1021 = vmatprep.subr.bf16.mxu1 %v1890_v3  ;;  %v184_v2 = vpack.c.bf16 %v112_v58, %v104_v57  ;;  %v1934_v3 = vld [vmem:[#allocation6 + $0x164] ss:$8 sps:$4 sm:$0xff]   ;;  %v1959_v54 = vld [vmem:[#allocation6 + $0x3a0] ss:$8 sps:$4 sm:$0xff]   ;;  %v204_v57 = vpack.c.bf16 %v148_v51, %v148_v51  ;;  %v102_v51 = vld [vmem:[#allocation3 + $0x198] sm:$0xff] }
  0x66   :  { %1223 = vmatprep.subr.bf16.mxu0 %v1892_v4  ;;  %v99_v4 = vld [vmem:[#allocation3 + $0x180] sm:$0xff] }
  0x68   :  { %1022 = vmatpush1.bf16.msra.mxu1 %v1894_v5  ;;  %v107_v5 = vld [vmem:[#allocation3 + $0x1c0] sm:$0xff] }
  0x69   :  { %1224 = vmatpush1.bf16.msra.mxu0 %v1895_v6  ;;  %1092 = vmatprep.subr.bf16.mxu1 %v1898_v7  ;;  %v103_v6 = vld [vmem:[#allocation3 + $0x1a0] sm:$0xff]  ;;  %v179_v11 = vpack.c.bf16 %v107_v5, %v99_v4  ;;  %v62_v4 = vld [vmem:[#allocation3 + $0x58] sm:$0xff] }
  0x6a   :  { %1294 = vmatprep.subr.bf16.mxu0 %v1901_v12  ;;  %v111_v7 = vld [vmem:[#allocation3 + $0x1e0] sm:$0xff]  ;;  %v58_v5 = vld [vmem:[#allocation3 + $0x38] sm:$0xff] }
  0x6b   :  { %1024 = vmatmul.mubr.bf16.vlgmr.msra.gmra.mrb[0].mxu1 %v155_v15  ;;  %v183_v12 = vpack.c.bf16 %v111_v7, %v103_v6  ;;  %v1932_v15 = vld [vmem:[#allocation6 + $0x160] ss:$8 sps:$4 sm:$0xff]   ;;  %v66_v6 = vld [vmem:[#allocation3 + $0x78] sm:$0xff] }
  0x6c   :  { %1226 = vmatmul.mubr.bf16.vlgmr.msra.gmra.mrb[0].mxu0 %v159_v16  ;;  %1093 = vmatpush1.bf16.msra.mxu1 %v1896_v19  ;;  %v1935_v16 = vld [vmem:[#allocation6 + $0x360] ss:$8 sps:$4 sm:$0xff]   ;;  %v1938_v19 = vld [vmem:[#allocation6 + $0x170] ss:$8 sps:$4 sm:$0xff]  }
  0x6d   :  { %1295 = vmatpush1.bf16.msra.mxu0 %v1899_v20  ;;  %1094 = vmatprep.subr.bf16.mxu1 %v1904_v21  ;;  %v1941_v20 = vld [vmem:[#allocation6 + $0x370] ss:$8 sps:$4 sm:$0xff]   ;;  %v188_v21 = vpack.c.bf16 %v124_v10, %v116_v9  ;;  %v1968_v7 = vld [vmem:[#allocation6 + $0x1c0] ss:$8 sps:$4 sm:$0xff]   ;;  %v1976_v9 = vld [vmem:[#allocation6 + $0x1d4] ss:$8 sps:$4 sm:$0xff]  }
  0x6e   :  { %1296 = vmatprep.subr.bf16.mxu0 %v1907_v22  ;;  %1033 = vmatprep.mubr.bf16.mxu1 %v164_v25  ;;  %v192_v22 = vpack.c.bf16 %v128_v14, %v120_v13  ;;  %v123_v25 = vld [vmem:[#allocation3 + $0x240] sm:$0xff]  ;;  %v1979_v10 = vld [vmem:[#allocation6 + $0x3d4] ss:$8 sps:$4 sm:$0xff]   ;;  %v1974_v13 = vld [vmem:[#allocation6 + $0x1d0] ss:$8 sps:$4 sm:$0xff]  }
  0x6f   :  { %1235 = vmatprep.mubr.bf16.mxu0 %v168_v26  ;;  %v119_v26 = vld [vmem:[#allocation3 + $0x220] sm:$0xff]  ;;  %v1977_v14 = vld [vmem:[#allocation6 + $0x3d0] ss:$8 sps:$4 sm:$0xff]  }
  0x70   :  { %1095 = vmatpush1.bf16.msra.mxu1 %v1902_v23  ;;  %v1946_v23 = vld [vmem:[#allocation6 + $0x184] ss:$8 sps:$4 sm:$0xff]  }
  0x71   :  { %1297 = vmatpush1.bf16.msra.mxu0 %v1905_v24  ;;  %1096 = vmatprep.subr.bf16.mxu1 %v1910_v27  ;;  %v115_v24 = vld [vmem:[#allocation3 + $0x200] sm:$0xff] }
  0x72   :  { %1298 = vmatprep.subr.bf16.mxu0 %v1913_v32  ;;  %v127_v27 = vld [vmem:[#allocation3 + $0x260] sm:$0xff]  ;;  %v187_v31 = vpack.c.bf16 %v123_v25, %v115_v24  ;;  %v61_v24 = vld [vmem:[#allocation3 + $0x50] sm:$0xff] }
  0x73   :  { %1034 = vmatmul.mubr.bf16.gmra.mrb[4].mxu1 %v163_v35  ;;  %v191_v32 = vpack.c.bf16 %v127_v27, %v119_v26  ;;  %v1944_v35 = vld [vmem:[#allocation6 + $0x180] ss:$8 sps:$4 sm:$0xff]   ;;  %v57_v25 = vld [vmem:[#allocation3 + $0x30] sm:$0xff]  ;;  %v70_v27 = vld [vmem:[#allocation3 + $0x98] sm:$0xff] }
  0x74   :  { %1236 = vmatmul.mubr.bf16.gmra.mrb[4].mxu0 %v167_v36  ;;  %1097 = vmatpush1.bf16.msra.mxu1 %v1908_v39  ;;  %v1947_v36 = vld [vmem:[#allocation6 + $0x380] ss:$8 sps:$4 sm:$0xff]   ;;  %v1950_v39 = vld [vmem:[#allocation6 + $0x190] ss:$8 sps:$4 sm:$0xff]  }
  0x75   :  { %1299 = vmatpush1.bf16.msra.mxu0 %v1911_v40  ;;  %1098 = vmatprep.subr.bf16.mxu1 %v1916_v41  ;;  %v1953_v40 = vld [vmem:[#allocation6 + $0x390] ss:$8 sps:$4 sm:$0xff]   ;;  %v196_v41 = vpack.c.bf16 %v140_v30, %v132_v29 }
  0x76   :  { %1300 = vmatprep.subr.bf16.mxu0 %v1919_v42  ;;  %1043 = vmatprep.mubr.bf16.mxu1 %v172_v45  ;;  %v200_v42 = vpack.c.bf16 %v144_v34, %v136_v33  ;;  %v139_v45 = vld [vmem:[#allocation3 + $0x2c0] sm:$0xff]  ;;  %v65_v26 = vld [vmem:[#allocation3 + $0x70] sm:$0xff]  ;;  %v74_v29 = vld [vmem:[#allocation3 + $0xb8] sm:$0xff] }
  0x77   :  { %1245 = vmatprep.mubr.bf16.mxu0 %v176_v46  ;;  %v135_v46 = vld [vmem:[#allocation3 + $0x2a0] sm:$0xff]  ;;  %v82_v30 = vld [vmem:[#allocation3 + $0xf8] sm:$0xff] }
  0x78   :  { %1099 = vmatpush1.bf16.msra.mxu1 %v1914_v43  ;;  %v131_v43 = vld [vmem:[#allocation3 + $0x280] sm:$0xff]  ;;  %v170_v34 = vpack.c.bf16 %v82_v30, %v74_v29  ;;  %v149_v29 = vld [vmem:[#allocation3 + $0x310] sm:$0xf] }
  0x79   :  { %1301 = vmatpush1.bf16.msra.mxu0 %v1917_v44  ;;  %1100 = vmatprep.subr.bf16.mxu1 %v1922_v47  ;;  %v1958_v44 = vld [vmem:[#allocation6 + $0x1a4] ss:$8 sps:$4 sm:$0xff]   ;;  %v195_v49 = vpack.c.bf16 %v139_v45, %v131_v43  ;;  %v153_v30 = vld [vmem:[#allocation3 + $0x330] sm:$0xf] }
  0x7a   :  { %1302 = vmatprep.subr.bf16.mxu0 %v1925_v52  ;;  %v143_v47 = vld [vmem:[#allocation3 + $0x2e0] sm:$0xff]  ;;  %v152_v52 = vld [vmem:[#allocation3 + $0x328] sm:$0xf] }
  0x7b   :  { %1044 = vmatmul.mubr.bf16.gmra.mrb[8].mxu1 %v171_v55  ;;  %v199_v50 = vpack.c.bf16 %v143_v47, %v135_v46  ;;  %v1964_v55 = vld [vmem:[#allocation6 + $0x1b4] ss:$8 sps:$4 sm:$0xff]   ;;  %v208_v58 = vpack.c.bf16 %v152_v52, %v152_v52 }
  0x7c   :  { %1246 = vmatmul.mubr.bf16.gmra.mrb[8].mxu0 %v175_v56  ;;  %1101 = vmatpush1.bf16.msra.mxu1 %v1920_v59  ;;  %v1967_v56 = vld [vmem:[#allocation6 + $0x3b4] ss:$8 sps:$4 sm:$0xff]   ;;  %v1962_v59 = vld [vmem:[#allocation6 + $0x1b0] ss:$8 sps:$4 sm:$0xff]  }
  0x7d   :  { %1303 = vmatpush1.bf16.msra.mxu0 %v1923_v60  ;;  %1102 = vmatprep.subr.bf16.mxu1 %v1928_v61  ;;  %v1965_v60 = vld [vmem:[#allocation6 + $0x3b0] ss:$8 sps:$4 sm:$0xff]   ;;  %v147_v61 = vld [vmem:[#allocation3 + $0x300] sm:$0xf] }
  0x7e   :  { %1304 = vmatprep.subr.bf16.mxu0 %v1931_v62  ;;  %1053 = vmatprep.mubr.bf16.mxu1 %v180_v1  ;;  %v151_v62 = vld [vmem:[#allocation3 + $0x320] sm:$0xf]  ;;  %v54_v1 = vld [vmem:[#allocation3 + $0x18] sm:$0xff]  ;;  %v85_v47 = vld [vmem:[#allocation3 + $0x110] sm:$0xff] }
  0x7f   :  { %1255 = vmatprep.mubr.bf16.mxu0 %v184_v2  ;;  %v203_v2 = vpack.c.bf16 %v147_v61, %v147_v61  ;;  %v110_v52 = vld [vmem:[#allocation3 + $0x1d8] sm:$0xff]  ;;  %v105_v61 = vld [vmem:[#allocation3 + $0x1b0] sm:$0xff] }
  0x80   :  { %1103 = vmatpush1.bf16.msra.mxu1 %v1926_v63  ;;  %v1970_v63 = vld [vmem:[#allocation6 + $0x1c4] ss:$8 sps:$4 sm:$0xff]  }
  0x81   :  { %1305 = vmatpush1.bf16.msra.mxu0 %v1929_v0  ;;  %1104 = vmatprep.subr.bf16.mxu1 %v1934_v3  ;;  %v1973_v0 = vld [vmem:[#allocation6 + $0x3c4] ss:$8 sps:$4 sm:$0xff]   ;;  %v207_v3 = vpack.c.bf16 %v151_v62, %v151_v62  ;;  %v113_v62 = vld [vmem:[#allocation3 + $0x1f0] sm:$0xff] }
  0x82   :  { %1306 = vmatprep.subr.bf16.mxu0 %v1937_v8  ;;  %v1971_v8 = vld [vmem:[#allocation6 + $0x3c0] ss:$8 sps:$4 sm:$0xff]  }
  0x83   :  { %1054 = vmatmul.mubr.bf16.gmra.mrb[12].mxu1 %v179_v11  ;;  %v158_v11 = vpack.c.bf16 %v62_v4, %v54_v1  ;;  %v122_v1 = vld [vmem:[#allocation3 + $0x238] sm:$0xff]  ;;  %v185_v4 = vpack.c.bf16 %v113_v62, %v105_v61 }
  0x84   :  { %1256 = vmatmul.mubr.bf16.gmra.mrb[12].mxu0 %v183_v12  ;;  %1105 = vmatpush1.bf16.msra.mxu1 %v1932_v15  ;;  %v162_v12 = vpack.c.bf16 %v66_v6, %v58_v5  ;;  %v1982_v15 = vld [vmem:[#allocation6 + $0x1e4] ss:$8 sps:$4 sm:$0xff]  }
  0x85   :  { %1307 = vmatpush1.bf16.msra.mxu0 %v1935_v16  ;;  %1106 = vmatprep.subr.bf16.mxu1 %v1940_v17  ;;  %v1985_v16 = vld [vmem:[#allocation6 + $0x3e4] ss:$8 sps:$4 sm:$0xff]   ;;  %v1980_v17 = vld [vmem:[#allocation6 + $0x1e0] ss:$8 sps:$4 sm:$0xff]  }
  0x86   :  { %1308 = vmatprep.subr.bf16.mxu0 %v1943_v18  ;;  %1063 = vmatprep.mubr.bf16.mxu1 %v188_v21  ;;  %v1983_v18 = vld [vmem:[#allocation6 + $0x3e0] ss:$8 sps:$4 sm:$0xff]   ;;  %v1986_v21 = vld [vmem:[#allocation6 + $0x1f0] ss:$8 sps:$4 sm:$0xff]  }
  0x87   :  { %1265 = vmatprep.mubr.bf16.mxu0 %v192_v22  ;;  %v1989_v22 = vld [vmem:[#allocation6 + $0x3f0] ss:$8 sps:$4 sm:$0xff]  }
  0x88   :  { %1107 = vmatpush1.bf16.msra.mxu1 %v1938_v19  ;;  %v1988_v19 = vld [vmem:[#allocation6 + $0x1f4] ss:$8 sps:$4 sm:$0xff]  }
  0x89   :  { %1309 = vmatpush1.bf16.msra.mxu0 %v1941_v20  ;;  %1108 = vmatprep.subr.bf16.mxu1 %v1946_v23  ;;  %v1991_v20 = vld [vmem:[#allocation6 + $0x3f4] ss:$8 sps:$4 sm:$0xff]  }
  0x8a   :  { %1310 = vmatprep.subr.bf16.mxu0 %v1949_v28  ;;  %v53_v23 = vld [vmem:[#allocation3 + $0x10] sm:$0xff]  ;;  %v78_v28 = vld [vmem:[#allocation3 + $0xd8] sm:$0xff] }
  0x8b   :  { %1064 = vmatmul.mubr.bf16.gmra.mrb[16].mxu1 %v187_v31  ;;  %v157_v31 = vpack.c.bf16 %v61_v24, %v53_v23  ;;  %v166_v33 = vpack.c.bf16 %v78_v28, %v70_v27  ;;  %v150_v23 = vld [vmem:[#allocation3 + $0x318] sm:$0xf] }
  0x8c   :  { %1266 = vmatmul.mubr.bf16.gmra.mrb[16].mxu0 %v191_v32  ;;  %1109 = vmatpush1.bf16.msra.mxu1 %v1944_v35  ;;  %v161_v32 = vpack.c.bf16 %v65_v26, %v57_v25  ;;  %v69_v35 = vld [vmem:[#allocation3 + $0x90] sm:$0xff]  ;;  %v154_v24 = vld [vmem:[#allocation3 + $0x338] sm:$0xf]  ;;  %v206_v27 = vpack.c.bf16 %v150_v23, %v150_v23 }
  0x8d   :  { %1311 = vmatpush1.bf16.msra.mxu0 %v1947_v36  ;;  %1110 = vmatprep.subr.bf16.mxu1 %v1952_v37  ;;  %v77_v36 = vld [vmem:[#allocation3 + $0xd0] sm:$0xff]  ;;  %v210_v28 = vpack.c.bf16 %v154_v24, %v154_v24 }
  0x8e   :  { %1312 = vmatprep.subr.bf16.mxu0 %v1955_v38  ;;  %1073 = vmatprep.mubr.bf16.mxu1 %v196_v41  ;;  %v73_v37 = vld [vmem:[#allocation3 + $0xb0] sm:$0xff]  ;;  %v90_v41 = vld [vmem:[#allocation3 + $0x138] sm:$0xff]  ;;  %v165_v43 = vpack.c.bf16 %v77_v36, %v69_v35 }
  0x8f   :  { %1275 = vmatprep.mubr.bf16.mxu0 %v200_v42  ;;  %v81_v38 = vld [vmem:[#allocation3 + $0xf0] sm:$0xff]  ;;  %v98_v42 = vld [vmem:[#allocation3 + $0x178] sm:$0xff] }
  0x90   :  { %1111 = vmatpush1.bf16.msra.mxu1 %v1950_v39  ;;  %v86_v39 = vld [vmem:[#allocation3 + $0x118] sm:$0xff]  ;;  %v178_v46 = vpack.c.bf16 %v98_v42, %v90_v41 }
  0x91   :  { %1313 = vmatpush1.bf16.msra.mxu0 %v1953_v40  ;;  %1112 = vmatprep.subr.bf16.mxu1 %v1958_v44  ;;  %v94_v40 = vld [vmem:[#allocation3 + $0x158] sm:$0xff]  ;;  %v169_v44 = vpack.c.bf16 %v81_v38, %v73_v37 }
  0x92   :  { %1314 = vmatprep.subr.bf16.mxu0 %v1961_v48  ;;  %v174_v45 = vpack.c.bf16 %v94_v40, %v86_v39  ;;  %v93_v48 = vld [vmem:[#allocation3 + $0x150] sm:$0xff]  ;;  %v2184_v36 = vld [vmem:[%s2241_s3] sm:$0x3]  ;;  %v2122_v39 = vmov 0  }
  0x93   :  { %1074 = vmatmul.mubr.bf16.gmra.mrb[20].mxu1 %v195_v49  ;;  %v89_v49 = vld [vmem:[#allocation3 + $0x130] sm:$0xff]  ;;  %v1422_v38 = vld [vmem:[#allocation2] sm:$0x1]  ;;  %1799 = vset.pattern.permute.xlu0 %v2122_v39 }
  0x94   :  { %1276 = vmatmul.mubr.bf16.gmra.mrb[20].mxu0 %v199_v50  ;;  %1113 = vmatpush1.bf16.msra.mxu1 %v1956_v53  ;;  %v97_v50 = vld [vmem:[#allocation3 + $0x170] sm:$0xff]  ;;  %v106_v53 = vld [vmem:[#allocation3 + $0x1b8] sm:$0xff] }
  0x95   :  { %1315 = vmatpush1.bf16.msra.mxu0 %v1959_v54  ;;  %1114 = vmatprep.subr.bf16.mxu1 %v1964_v55  ;;  %v114_v54 = vld [vmem:[#allocation3 + $0x1f8] sm:$0xff]  ;;  %v173_v55 = vpack.c.bf16 %v93_v48, %v85_v47 }
  0x96   :  { %1316 = vmatprep.subr.bf16.mxu0 %v1967_v56  ;;  %1083 = vmatprep.mubr.bf16.mxu1 %v204_v57  ;;  %v177_v56 = vpack.c.bf16 %v97_v50, %v89_v49  ;;  %v182_v57 = vpack.c.bf16 %v110_v52, %v102_v51  ;;  %v339_v41 = vld [vmem:[%s2240_s2] sm:$0x3]  ;;  %s2123_s2 = smov [#allocation8]  }
  0x97   :  { %1285 = vmatprep.mubr.bf16.mxu0 %v208_v58  ;;  %v186_v58 = vpack.c.bf16 %v114_v54, %v106_v53  ;;  %1425 = vperm.xlu0 %1799, %v1422_v38   ;;  %s1521_s3 = sshll.u32 %s2123_s2, 4  ;;  %s1522_s3 = int_to_ptr.vmem [resolvable:$true] %s1521_s3 }
  0x98   :  { %1115 = vmatpush1.bf16.msra.mxu1 %v1962_v59  ;;  %v101_v59 = vld [vmem:[#allocation3 + $0x190] sm:$0xff]  ;;  %s2088_s24 = scalar_lea.vmem %s1522_s3, 16  ;;  %s2092_s25 = scalar_lea.vmem %s1522_s3, 32 }
  0x99   :  { %1317 = vmatpush1.bf16.msra.mxu0 %v1965_v60  ;;  %1116 = vmatprep.subr.bf16.mxu1 %v1970_v63  ;;  %v109_v60 = vld [vmem:[#allocation3 + $0x1d0] sm:$0xff]  ;;  %v118_v63 = vld [vmem:[#allocation3 + $0x218] sm:$0xff]  ;;  %p2089_p2 = scmp.ne.s32.totalorder %s1522_s3, %s2088_s24  ;;  %p2093_p3 = scmp.lt.s32.totalorder %s1522_s3, %s1522_s3 }
  0x9a   :  { %1318 = vmatprep.subr.bf16.mxu0 %v1973_v0  ;;  %v126_v0 = vld [vmem:[#allocation3 + $0x258] sm:$0xff]  ;;  %p2094_p4 = scmp.lt.s32.totalorder %s2092_s25, %s2088_s24 }
  0x9b   :  { %1084 = vmatmul.mubr.bf16.gmra.mrb[24].mxu1 %v203_v2  ;;  %v130_v2 = vld [vmem:[#allocation3 + $0x278] sm:$0xff]  ;;  %v190_v5 = vpack.c.bf16 %v126_v0, %v118_v63 }
  0x9c   :  { %1286 = vmatmul.mubr.bf16.gmra.mrb[24].mxu0 %v207_v3  ;;  %1117 = vmatpush1.bf16.msra.mxu1 %v1968_v7  ;;  %v181_v3 = vpack.c.bf16 %v109_v60, %v101_v59  ;;  %v194_v6 = vpack.c.bf16 %v130_v2, %v122_v1  ;;  %v117_v7 = vld [vmem:[#allocation3 + $0x210] sm:$0xff]  ;;  %p2095_p5 = por %p2094_p4, %p2093_p3 }
  0x9d   :  { %1319 = vmatpush1.bf16.msra.mxu0 %v1971_v8  ;;  %1118 = vmatprep.subr.bf16.mxu1 %v1976_v9  ;;  %v125_v8 = vld [vmem:[#allocation3 + $0x250] sm:$0xff] }
  0x9e   :  { %1320 = vmatprep.subr.bf16.mxu0 %v1979_v10  ;;  %1124 = vmatprep.mubr.bf16.mxu1 %v158_v11  ;;  %v121_v9 = vld [vmem:[#allocation3 + $0x230] sm:$0xff]  ;;  %v134_v11 = vld [vmem:[#allocation3 + $0x298] sm:$0xff]  ;;  %p2096_p6 = pnand %p2095_p5, %p2089_p2 }
  0x9f   :  { %1326 = vmatprep.mubr.bf16.mxu0 %v162_v12  ;;  %v129_v10 = vld [vmem:[#allocation3 + $0x270] sm:$0xff]  ;;  %v142_v12 = vld [vmem:[#allocation3 + $0x2d8] sm:$0xff] }
  0xa0   :  { %1119 = vmatpush1.bf16.msra.mxu1 %v1974_v13  ;;  %v138_v13 = vld [vmem:[#allocation3 + $0x2b8] sm:$0xff] }
  0xa1   :  { %1321 = vmatpush1.bf16.msra.mxu0 %v1977_v14  ;;  %1120 = vmatprep.subr.bf16.mxu1 %v1982_v15  ;;  %v146_v14 = vld [vmem:[#allocation3 + $0x2f8] sm:$0xff]  ;;  %v189_v15 = vpack.c.bf16 %v125_v8, %v117_v7 }
  0xa2   :  { %1322 = vmatprep.subr.bf16.mxu0 %v1985_v16  ;;  %v193_v16 = vpack.c.bf16 %v129_v10, %v121_v9 }
  0xa4   :  { %1121 = vmatpush1.bf16.msra.mxu1 %v1980_v17  ;;  %v198_v17 = vpack.c.bf16 %v142_v12, %v134_v11 }
  0xa5   :  { %1323 = vmatpush1.bf16.msra.mxu0 %v1983_v18  ;;  %1122 = vmatprep.subr.bf16.mxu1 %v1988_v19  ;;  %v202_v18 = vpack.c.bf16 %v146_v14, %v138_v13  ;;  %v133_v19 = vld [vmem:[#allocation3 + $0x290] sm:$0xff] }
  0xa6   :  { %1324 = vmatprep.subr.bf16.mxu0 %v1991_v20  ;;  %v141_v20 = vld [vmem:[#allocation3 + $0x2d0] sm:$0xff] }
  0xa7   :  { %v197_v25 = vpack.c.bf16 %v141_v20, %v133_v19 }
  0xa8   :  { %1123 = vmatpush1.bf16.msra.mxu1 %v1986_v21  ;;  %v137_v21 = vld [vmem:[#allocation3 + $0x2b0] sm:$0xff] }
  0xa9   :  { %1325 = vmatpush1.bf16.msra.mxu0 %v1989_v22  ;;  %v145_v22 = vld [vmem:[#allocation3 + $0x2f0] sm:$0xff] }
  0xaa   :  { %v201_v26 = vpack.c.bf16 %v145_v22, %v137_v21 }
  0xab   :  { %1125 = vmatmul.mubr.bf16.vlgmr.msra.gmra.mrb[0].mxu1 %v157_v31  ;;  %v205_v31 = vpack.c.bf16 %v149_v29, %v149_v29 }
  0xac   :  { %1327 = vmatmul.mubr.bf16.vlgmr.msra.gmra.mrb[0].mxu0 %v161_v32  ;;  %1134 = vmatprep.mubr.bf16.mxu1 %v166_v33  ;;  %v209_v32 = vpack.c.bf16 %v153_v30, %v153_v30  ;;  %v341_v33 = vlaneseq }
  0xad   :  { %1336 = vmatprep.mubr.bf16.mxu0 %v170_v34 }
  0xae   :  { %v342_v34 = vshrl.u32 %v341_v33, 7 }
  0xb0   :  { %v347_v35 = vsub.s32 1, %v342_v34  ;;  %v2187_v40 = vsub.s32 0, %v342_v34 }
  0xb2   :  { %v1440_v37 = vrot.slane %v2184_v36, %v347_v35  ;;  %v2193_v42 = vrot.slane %v339_v41, %v2187_v40 }
  0xb3   :  { %1135 = vmatmul.mubr.bf16.gmra.mrb[4].mxu1 %v165_v43  ;;  %v2195_v43 = vrot.slane %v339_v41, %v347_v35 }
  0xb4   :  { %1337 = vmatmul.mubr.bf16.gmra.mrb[4].mxu0 %v169_v44  ;;  %1144 = vmatprep.mubr.bf16.mxu1 %v174_v45 }
  0xb5   :  { %1346 = vmatprep.mubr.bf16.mxu0 %v178_v46 }
  0xbb   :  { %1145 = vmatmul.mubr.bf16.gmra.mrb[8].mxu1 %v173_v55 }
  0xbc   :  { %1347 = vmatmul.mubr.bf16.gmra.mrb[8].mxu0 %v177_v56  ;;  %1154 = vmatprep.mubr.bf16.mxu1 %v182_v57 }
  0xbd   :  { %1356 = vmatprep.mubr.bf16.mxu0 %v186_v58 }
  0xc3   :  { %1155 = vmatmul.mubr.bf16.gmra.mrb[12].mxu1 %v181_v3 }
  0xc4   :  { %1357 = vmatmul.mubr.bf16.gmra.mrb[12].mxu0 %v185_v4  ;;  %1164 = vmatprep.mubr.bf16.mxu1 %v190_v5 }
  0xc5   :  { %1366 = vmatprep.mubr.bf16.mxu0 %v194_v6 }
  0xcb   :  { %1165 = vmatmul.mubr.bf16.gmra.mrb[16].mxu1 %v189_v15 }
  0xcc   :  { %1367 = vmatmul.mubr.bf16.gmra.mrb[16].mxu0 %v193_v16  ;;  %1174 = vmatprep.mubr.bf16.mxu1 %v198_v17 }
  0xcd   :  { %1376 = vmatprep.mubr.bf16.mxu0 %v202_v18 }
  0xd3   :  { %1175 = vmatmul.mubr.bf16.gmra.mrb[20].mxu1 %v197_v25 }
  0xd4   :  { %1377 = vmatmul.mubr.bf16.gmra.mrb[20].mxu0 %v201_v26  ;;  %1184 = vmatprep.mubr.bf16.mxu1 %v206_v27 }
  0xd5   :  { %1386 = vmatprep.mubr.bf16.mxu0 %v210_v28 }
  0xdb   :  { %1185 = vmatmul.mubr.bf16.gmra.mrb[24].mxu1 %v205_v31 }
  0xdc   :  { %1387 = vmatmul.mubr.bf16.gmra.mrb[24].mxu0 %v209_v32  ;;  %1507 = vmatprep.mubr.f32.mxu1 %v1440_v37 }
 0x17e   :  { %v1126_v44 = vpop.f32.mrb[0].mxu1 }
 0x17f   :  { %v1328_v45 = vpop.f32.mrb[0].mxu0  ;;  %v1683_v46 = vadd.f32 %v1126_v44, %v2193_v42  ;;  %v1128_v47 = vpop.f32.mrb[1].mxu1 }
 0x180   :  { %v1330_v48 = vpop.f32.mrb[1].mxu0  ;;  %v1685_v49 = vadd.f32 %v1128_v47, %v2195_v43  ;;  %v1130_v50 = vpop.f32.mrb[2].mxu1 }
 0x181   :  { %v1332_v51 = vpop.f32.mrb[2].mxu0  ;;  %v1684_v52 = vadd.f32 %v1683_v46, %v1328_v45  ;;  %v1687_v53 = vadd.f32 %v1130_v50, %v2193_v42  ;;  %v1132_v54 = vpop.f32.mrb[3].mxu1 }
 0x182   :  { %v1334_v55 = vpop.f32.mrb[3].mxu0  ;;  %v1686_v56 = vadd.f32 %v1685_v49, %v1330_v48  ;;  %v1689_v57 = vadd.f32 %v1132_v54, %v2195_v43 }
 0x183   :  { %1992 = vtanh.f32 %v1684_v52  ;;  %v1688_v58 = vadd.f32 %v1687_v53, %v1332_v51 }
 0x184   :  { %1994 = vtanh.f32 %v1686_v56  ;;  %v1690_v59 = vadd.f32 %v1689_v57, %v1334_v55 }
 0x185   :  { %1996 = vtanh.f32 %v1688_v58 }
 0x186   :  { %1998 = vtanh.f32 %v1690_v59  ;;  %v1136_v60 = vpop.f32.mrb[4].mxu1 }
 0x187   :  { %v1338_v61 = vpop.f32.mrb[4].mxu0  ;;  %v1691_v62 = vadd.f32 %v1136_v60, %v2193_v42  ;;  %v1138_v63 = vpop.f32.mrb[5].mxu1 }
 0x188   :  { %v1340_v0 = vpop.f32.mrb[5].mxu0  ;;  %v1693_v1 = vadd.f32 %v1138_v63, %v2195_v43  ;;  %v1140_v2 = vpop.f32.mrb[6].mxu1 }
 0x189   :  { %v1342_v3 = vpop.f32.mrb[6].mxu0  ;;  %v1692_v4 = vadd.f32 %v1691_v62, %v1338_v61  ;;  %v1695_v5 = vadd.f32 %v1140_v2, %v2193_v42  ;;  %v1142_v6 = vpop.f32.mrb[7].mxu1 }
 0x18a   :  { %v1344_v7 = vpop.f32.mrb[7].mxu0  ;;  %v1694_v8 = vadd.f32 %v1693_v1, %v1340_v0  ;;  %v1697_v9 = vadd.f32 %v1142_v6, %v2195_v43 }
 0x18b   :  { %2000 = vtanh.f32 %v1692_v4  ;;  %v1696_v10 = vadd.f32 %v1695_v5, %v1342_v3 }
 0x18c   :  { %2002 = vtanh.f32 %v1694_v8  ;;  %v1698_v11 = vadd.f32 %v1697_v9, %v1344_v7 }
 0x18d   :  { %v1993_v12 = vpop.eup %1992  ;;  %2004 = vtanh.f32 %v1696_v10 }
 0x18e   :  { %v1995_v13 = vpop.eup %1994  ;;  %2006 = vtanh.f32 %v1698_v11  ;;  %v1146_v14 = vpop.f32.mrb[8].mxu1 }
 0x18f   :  { %v1348_v15 = vpop.f32.mrb[8].mxu0  ;;  %v1997_v16 = vpop.eup %1996  ;;  %v1699_v17 = vadd.f32 %v1146_v14, %v2193_v42 }
 0x190   :  { %v1148_v18 = vpop.f32.mrb[9].mxu1  ;;  %v1350_v19 = vpop.f32.mrb[9].mxu0  ;;  %v1661_v24 = vpack.c.bf16 %v1997_v16, %v1993_v12 }
 0x191   :  { %v1999_v20 = vpop.eup %1998  ;;  %v1701_v21 = vadd.f32 %v1148_v18, %v2195_v43  ;;  %v1150_v22 = vpop.f32.mrb[10].mxu1  ;;  %v1700_v25 = vadd.f32 %v1699_v17, %v1348_v15 }
 0x192   :  { %v1352_v23 = vpop.f32.mrb[10].mxu0  ;;  %v1703_v26 = vadd.f32 %v1150_v22, %v2193_v42  ;;  %v1152_v27 = vpop.f32.mrb[11].mxu1  ;;  %v1659_v29 = vpack.c.bf16 %v1999_v20, %v1995_v13 }
 0x193   :  { %v1354_v28 = vpop.f32.mrb[11].mxu0  ;;  %v1702_v30 = vadd.f32 %v1701_v21, %v1350_v19  ;;  %v1705_v31 = vadd.f32 %v1152_v27, %v2195_v43  ;;  %2008 = vtanh.f32 %v1700_v25 }
 0x194   :  { %v1704_v32 = vadd.f32 %v1703_v26, %v1352_v23  ;;  %1660 = vmatprep.subr.bf16.mxu1 %v1659_v29 }
 0x195   :  { %2010 = vtanh.f32 %v1702_v30  ;;  %v1706_v33 = vadd.f32 %v1705_v31, %v1354_v28  ;;  %1662 = vmatpush1.bf16.xpose.msra.mxu1 %v1661_v24  ;;  %v2001_v34 = vpop.eup %2000 }
 0x196   :  { %2012 = vtanh.f32 %v1704_v32  ;;  %v2003_v35 = vpop.eup %2002  ;;  %v1156_v37 = vpop.f32.mrb[12].mxu1 }
 0x197   :  { %2014 = vtanh.f32 %v1706_v33  ;;  %v1358_v38 = vpop.f32.mrb[12].mxu0  ;;  %v2005_v39 = vpop.eup %2004  ;;  %v1707_v41 = vadd.f32 %v1156_v37, %v2193_v42 }
 0x198   :  { %v1158_v44 = vpop.f32.mrb[13].mxu1  ;;  %v1360_v45 = vpop.f32.mrb[13].mxu0  ;;  %v1665_v50 = vpack.c.bf16 %v2005_v39, %v2001_v34 }
 0x199   :  { %v2007_v46 = vpop.eup %2006  ;;  %v1709_v47 = vadd.f32 %v1158_v44, %v2195_v43  ;;  %v1160_v48 = vpop.f32.mrb[14].mxu1  ;;  %v1708_v51 = vadd.f32 %v1707_v41, %v1358_v38 }
 0x19a   :  { %v1362_v49 = vpop.f32.mrb[14].mxu0  ;;  %v1711_v52 = vadd.f32 %v1160_v48, %v2193_v42  ;;  %v1162_v53 = vpop.f32.mrb[15].mxu1  ;;  %v1663_v55 = vpack.c.bf16 %v2007_v46, %v2003_v35 }
 0x19b   :  { %v1364_v54 = vpop.f32.mrb[15].mxu0  ;;  %v1710_v56 = vadd.f32 %v1709_v47, %v1360_v45  ;;  %v1713_v57 = vadd.f32 %v1162_v53, %v2195_v43  ;;  %2016 = vtanh.f32 %v1708_v51 }
 0x19c   :  { %v1712_v58 = vadd.f32 %v1711_v52, %v1362_v49  ;;  %1664 = vmatprep.subr.bf16.mxu1 %v1663_v55 }
 0x19d   :  { %2018 = vtanh.f32 %v1710_v56  ;;  %v1714_v59 = vadd.f32 %v1713_v57, %v1364_v54  ;;  %1666 = vmatpush1.bf16.xpose.msra.mxu1 %v1665_v50  ;;  %v2009_v60 = vpop.eup %2008 }
 0x19e   :  { %2020 = vtanh.f32 %v1712_v58  ;;  %v1166_v62 = vpop.f32.mrb[16].mxu1 }
 0x19f   :  { %v2011_v61 = vpop.eup %2010  ;;  %2022 = vtanh.f32 %v1714_v59  ;;  %v1368_v63 = vpop.f32.mrb[16].mxu0  ;;  %v1715_v1 = vadd.f32 %v1166_v62, %v2193_v42 }
 0x1a0   :  { %v2013_v0 = vpop.eup %2012  ;;  %v1168_v2 = vpop.f32.mrb[17].mxu1 }
 0x1a1   :  { %v1370_v3 = vpop.f32.mrb[17].mxu0  ;;  %v2015_v4 = vpop.eup %2014  ;;  %v1717_v5 = vadd.f32 %v1168_v2, %v2195_v43  ;;  %v1669_v8 = vpack.c.bf16 %v2013_v0, %v2009_v60  ;;  %v1716_v9 = vadd.f32 %v1715_v1, %v1368_v63 }
 0x1a2   :  { %v1170_v6 = vpop.f32.mrb[18].mxu1  ;;  %v1372_v7 = vpop.f32.mrb[18].mxu0  ;;  %v1667_v13 = vpack.c.bf16 %v2015_v4, %v2011_v61  ;;  %v1436_v4 = vrot.slane %v2184_v36, %v2187_v40 }
 0x1a3   :  { %v1719_v10 = vadd.f32 %v1170_v6, %v2193_v42  ;;  %v1172_v11 = vpop.f32.mrb[19].mxu1  ;;  %v1374_v12 = vpop.f32.mrb[19].mxu0  ;;  %v1718_v14 = vadd.f32 %v1717_v5, %v1370_v3  ;;  %2024 = vtanh.f32 %v1716_v9 }
 0x1a4   :  { %v1721_v15 = vadd.f32 %v1172_v11, %v2195_v43  ;;  %1668 = vmatprep.subr.bf16.mxu1 %v1667_v13  ;;  %v1426_v5 = vpop.permute.xlu0 %1425 }
 0x1a5   :  { %v1720_v16 = vadd.f32 %v1719_v10, %v1372_v7  ;;  %2026 = vtanh.f32 %v1718_v14  ;;  %1670 = vmatpush1.bf16.xpose.msra.mxu1 %v1669_v8  ;;  %v2017_v18 = vpop.eup %2016  ;;  %v1431_v6 = vrot.slane %v1426_v5, %v2187_v40 }
 0x1a6   :  { %v1722_v17 = vadd.f32 %v1721_v15, %v1374_v12  ;;  %v1176_v20 = vpop.f32.mrb[20].mxu1 }
 0x1a7   :  { %2028 = vtanh.f32 %v1720_v16  ;;  %v2019_v19 = vpop.eup %2018  ;;  %v1378_v21 = vpop.f32.mrb[20].mxu0  ;;  %v1723_v23 = vadd.f32 %v1176_v20, %v2193_v42 }
 0x1a8   :  { %2030 = vtanh.f32 %v1722_v17  ;;  %v2021_v22 = vpop.eup %2020  ;;  %v1178_v24 = vpop.f32.mrb[21].mxu1 }
 0x1a9   :  { %v1380_v25 = vpop.f32.mrb[21].mxu0  ;;  %v2023_v26 = vpop.eup %2022  ;;  %v1725_v27 = vadd.f32 %v1178_v24, %v2195_v43  ;;  %v1673_v30 = vpack.c.bf16 %v2021_v22, %v2017_v18  ;;  %v1724_v31 = vadd.f32 %v1723_v23, %v1378_v21 }
 0x1aa   :  { %v1180_v28 = vpop.f32.mrb[22].mxu1  ;;  %v1382_v29 = vpop.f32.mrb[22].mxu0  ;;  %v1671_v35 = vpack.c.bf16 %v2023_v26, %v2019_v19 }
 0x1ab   :  { %v1727_v32 = vadd.f32 %v1180_v28, %v2193_v42  ;;  %v1182_v33 = vpop.f32.mrb[23].mxu1  ;;  %v1384_v34 = vpop.f32.mrb[23].mxu0  ;;  %v1726_v37 = vadd.f32 %v1725_v27, %v1380_v25  ;;  %2032 = vtanh.f32 %v1724_v31 }
 0x1ac   :  { %v1729_v38 = vadd.f32 %v1182_v33, %v2195_v43  ;;  %1672 = vmatprep.subr.bf16.mxu1 %v1671_v35 }
 0x1ad   :  { %v1728_v39 = vadd.f32 %v1727_v32, %v1382_v29  ;;  %2034 = vtanh.f32 %v1726_v37  ;;  %1674 = vmatpush1.bf16.xpose.msra.mxu1 %v1673_v30  ;;  %v2025_v44 = vpop.eup %2024 }
 0x1ae   :  { %v1730_v41 = vadd.f32 %v1729_v38, %v1384_v34  ;;  %v1186_v46 = vpop.f32.mrb[24].mxu1 }
 0x1af   :  { %2036 = vtanh.f32 %v1728_v39  ;;  %v2027_v45 = vpop.eup %2026  ;;  %v1388_v47 = vpop.f32.mrb[24].mxu0  ;;  %v1731_v49 = vadd.f32 %v1186_v46, %v2193_v42 }
 0x1b0   :  { %2038 = vtanh.f32 %v1730_v41  ;;  %v1188_v50 = vpop.f32.mrb[25].mxu1  ;;  %v1390_v51 = vpop.f32.mrb[25].mxu0 }
 0x1b1   :  { %v2029_v48 = vpop.eup %2028  ;;  %v1733_v53 = vadd.f32 %v1188_v50, %v2195_v43  ;;  %v1190_v54 = vpop.f32.mrb[26].mxu1  ;;  %v1732_v57 = vadd.f32 %v1731_v49, %v1388_v47 }
 0x1b2   :  { %v2031_v52 = vpop.eup %2030  ;;  %v1392_v55 = vpop.f32.mrb[26].mxu0  ;;  %v1677_v56 = vpack.c.bf16 %v2029_v48, %v2025_v44 }
 0x1b3   :  { %v1191_v58 = vpop.f32.mrb[27].mxu1  ;;  %v1393_v59 = vpop.f32.mrb[27].mxu0  ;;  %v1675_v60 = vpack.c.bf16 %v2031_v52, %v2027_v45  ;;  %v1734_v61 = vadd.f32 %v1733_v53, %v1390_v51 }
 0x1b5   :  { %1676 = vmatprep.subr.bf16.mxu1 %v1675_v60  ;;  %2040 = vtanh.f32 %v1734_v61  ;;  %v2033_v62 = vpop.eup %2032 }
 0x1b6   :  { %1678 = vmatpush1.bf16.xpose.msra.mxu1 %v1677_v56  ;;  %2042 = vtanh.f32 %v1732_v57 }
 0x1b7   :  { %v2035_v63 = vpop.eup %2034 }
 0x1b9   :  { %v2037_v0 = vpop.eup %2036 }
 0x1ba   :  { %v2039_v42 = vpop.eup %2038  ;;  %v1681_v1 = vpack.c.bf16 %v2037_v0, %v2033_v62 }
 0x1bb   :  { %v1679_v2 = vpack.c.bf16 %v2039_v42, %v2035_v63 }
 0x1bd   :  { %1680 = vmatprep.subr.bf16.mxu1 %v1679_v2 }
 0x1be   :  { %1682 = vmatpush1.bf16.xpose.msra.mxu1 %v1681_v1 }
 0x1bf   :  { %v2041_v43 = vpop.eup %2040 }
 0x1c0   :  { %1467 = vmatprep.subr.mxu1 %v2041_v43  ;;  %v2043_v3 = vpop.eup %2042 }
 0x1c6   :  { %1468 = vmatpush1.xpose.msra.mxu1 %v2043_v3 }
 0x1c9   :  { %1508 = vmatmul.mubr.f32.vlgmr.msra.gmra.mrb[28].mxu1 %v1436_v4 }
 0x29c   :  { %v1509_v7 = vpop.f32.mrb[28].mxu1 }
 0x29d   :  { %v1510_v8 = vadd.f32 %v1509_v7, %v1431_v6  ;;  %v1511_v9 = vpop.f32.mrb[29].mxu1 }
 0x29f   :  { %1514 = vst.msk [vmem:[#allocation8] sm:$0x1] %vm1513_vm0, %v1510_v8 }
 0x2a0   :  { %2099 = shalt.err (!%p2096_p6)
}
 0x2a1   :  { %s2100_s28 = scalar_lea.hbm %s2243_s5, 16 }
 0x2a2   :  { %p2101_p7 = scmp.ne.s32.totalorder %s2243_s5, %s2100_s28  ;;  %p2104_p8 = scmp.lt.u32.totalorder %s2100_s28, %s2243_s5 }
 0x2a4   :  { %p2106_p9 = pnand %p2104_p8, %p2101_p7 }
 0x2a6   :  { %2109 = shalt.err (!%p2106_p9)
}
 0x2a7   :  { %1524 = dma.vmem_to_hbm [thread:$0]  %s1522_s3, 16, %s2243_s5, [#allocation5]  }
 0x2a8   :  { %2114 = dma.done.wait [#allocation5], 16  }
 0x2a9   :  { %2115 = vsyncadd [#allocation5], 4294967280 }
 0x2aa   :  { %1528 = vsyncpa [#allocation4], 1 }
 0x2ab   :  { %1529 = vsyncpa [#allocation7], 1 }
 0x2ac   :  { %1530 = vsyncpa [#allocation5], 1 }

</bundles_post_ra>
